<compile_context>
chip_gen: v6e
topology: v6e:2x2x1
jax: 0.10.0
libtpu: 0.0.40
codegen_flags: <defaults>
</compile_context>

<pallas_src>
import functools

import jax
import jax.numpy as jnp
from jax.experimental import pallas as pl
from jax.experimental.pallas import tpu as pltpu


def _round_up(n, m):
    return ((n + m - 1) // m) * m


def _tpu_chip_info():
    """(num_tensorcores_per_chip, physical_vmem_bytes, feature_alignment)."""
    kind = ""
    try:
        devs = jax.devices()
        if devs:
            kind = (getattr(devs[0], "device_kind", "") or "").lower()
    except Exception:
        pass
    is_v7 = "v7" in kind
    is_v5e = ("v5e" in kind) or ("v5 lite" in kind) or ("v5litepod" in kind)
    num_tc = 2 if is_v7 else 1                      # v7x: 2 TCs / chip
    vmem_bytes = (64 if is_v7 else 128) * 1024 * 1024
    feature_align = 128 if is_v5e else 256          # 256x256 MXU on v6e/v7x
    return num_tc, vmem_bytes, feature_align


def _choose_tile_b(batch, num_tc):
    """Batch tile: multiple of 16 (bf16 packing); split only for 2-TC chips."""
    b = _round_up(batch, 16)
    max_tile = 512 if num_tc >= 2 else 1024
    tile = min(max_tile, b)
    if num_tc >= 2 and b > 16 and (b // tile) < 2:
        # Give each TensorCore at least one grid step.
        tile = max(16, _round_up(-(-b // 2), 16))
    return tile


def _vmem_need(tile_b, in_p, hid_p, out_p, single_buffer_weights):
    wmul = 1 if single_buffer_weights else 2
    weight_bytes = ((in_p * in_p + in_p * hid_p + hid_p * out_p) * 2
                    + (in_p + hid_p + out_p) * 4)
    io_bytes = 2 * tile_b * in_p * 2 + 2 * tile_b * out_p * 4   # dbl-buffered x/out
    live_f32 = tile_b * (in_p + hid_p + out_p) * 4              # h1/h2/out live
    return wmul * weight_bytes + io_bytes + 2 * live_f32


def _discriminator_kernel(x_ref, w1_ref, b1_ref, w2_ref, b2_ref, w3_ref, b3_ref,
                          o_ref):
    # Fused 3x (MXU matmul, f32 accumulate) + f32 bias/ReLU epilogue.
    x = x_ref[...]                                     # bf16 [tile_b, in_p]
    h1 = jnp.dot(x, w1_ref[...], preferred_element_type=jnp.float32) + b1_ref[...]
    h1 = jnp.maximum(h1, 0.0)
    h2 = jnp.dot(h1.astype(w2_ref.dtype), w2_ref[...],
                 preferred_element_type=jnp.float32) + b2_ref[...]
    h2 = jnp.maximum(h2, 0.0)
    out = jnp.dot(h2.astype(w3_ref.dtype), w3_ref[...],
                  preferred_element_type=jnp.float32) + b3_ref[...]
    o_ref[...] = out.astype(o_ref.dtype)               # lane-dense (tile_b, 128)


def prepare_params(w1, b1, w2, b2, w3, b3):
    """One-time weight padding + bf16 casting (hoisted out of the forward)."""
    in_size = w1.shape[0]
    hid = w2.shape[1]
    out_dim = w3.shape[1]
    _, _, align = _tpu_chip_info()
    in_p = _round_up(in_size, align)
    hid_p = _round_up(hid, align)
    out_p = 128                      # lane-dense logits: pad 2 -> 128
    cd, f32 = jnp.bfloat16, jnp.float32
    w1p = jnp.pad(w1.astype(cd), ((0, in_p - in_size), (0, in_p - in_size)))
    b1p = jnp.pad(b1.astype(f32).reshape(1, -1), ((0, 0), (0, in_p - in_size)))
    w2p = jnp.pad(w2.astype(cd), ((0, in_p - in_size), (0, hid_p - hid)))
    b2p = jnp.pad(b2.astype(f32).reshape(1, -1), ((0, 0), (0, hid_p - hid)))
    w3p = jnp.pad(w3.astype(cd), ((0, hid_p - hid), (0, out_p - out_dim)))
    b3p = jnp.pad(b3.astype(f32).reshape(1, -1), ((0, 0), (0, out_p - out_dim)))
    params = tuple(jax.device_put(p)
                   for p in (w1p, b1p, w2p, b2p, w3p, b3p))
    dims = (in_size, hid, out_dim, in_p, hid_p, out_p)
    return params, dims


@functools.partial(jax.jit, static_argnames=("dims", "single_buffer_weights"))
def _forward_impl(x, w1p, b1p, w2p, b2p, w3p, b3p, *, dims,
                  single_buffer_weights):
    in_size, hid, out_dim, in_p, hid_p, out_p = dims
    B = x.shape[0]
    num_tc, vmem_bytes, _ = _tpu_chip_info()
    budget = int(vmem_bytes * 0.80)

    tile_b = _choose_tile_b(B, num_tc)
    while (tile_b > 16 and
           _vmem_need(tile_b, in_p, hid_p, out_p, single_buffer_weights) > budget):
        tile_b = max(16, _round_up(tile_b // 2, 16))
    # TODO(synk): for very large in_size where resident weights alone exceed the
    # v7x VMEM budget, add a K-tiled grid axis with an f32 accumulator scratch
    # instead of keeping W1 fully resident.

    B_pad = _round_up(B, tile_b)
    x_p = jnp.pad(x.astype(jnp.bfloat16),
                  ((0, B_pad - B), (0, in_p - in_size)))

    grid = (B_pad // tile_b,)
    full_map = lambda i: (0, 0)

    def wspec(shape):
        # Grid-invariant operand: single buffer is enough (index_map constant).
        if single_buffer_weights and hasattr(pl, "Buffered"):
            try:
                return pl.BlockSpec(shape, full_map,
                                    pipeline_mode=pl.Buffered(1))
            except TypeError:
                return pl.BlockSpec(shape, full_map)
        return pl.BlockSpec(shape, full_map)

    weight_bytes = ((in_p * in_p + in_p * hid_p + hid_p * out_p) * 2
                    + (in_p + hid_p + out_p) * 4)
    cost = pl.CostEstimate(
        flops=2 * B_pad * (in_p * in_p + in_p * hid_p + hid_p * out_p),
        transcendentals=0,
        bytes_accessed=B_pad * in_p * 2 + weight_bytes + B_pad * out_p * 4,
    )
    vmem_need = _vmem_need(tile_b, in_p, hid_p, out_p, single_buffer_weights)
    vmem_limit = int(min(budget, max(2 * vmem_need, 16 * 1024 * 1024)))

    out = pl.pallas_call(
        _discriminator_kernel,
        out_shape=jax.ShapeDtypeStruct((B_pad, out_p), jnp.float32),
        grid_spec=pltpu.PrefetchScalarGridSpec(
            num_scalar_prefetch=0,
            grid=grid,
            in_specs=[
                pl.BlockSpec((tile_b, in_p), lambda i: (i, 0)),   # x tile
                wspec((in_p, in_p)),                              # W1 (resident)
                wspec((1, in_p)),                                 # b1
                wspec((in_p, hid_p)),                             # W2 (resident)
                wspec((1, hid_p)),                                # b2
                wspec((hid_p, out_p)),                            # W3 (resident)
                wspec((1, out_p)),                                # b3
            ],
            out_specs=pl.BlockSpec((tile_b, out_p), lambda i: (i, 0)),
        ),
        compiler_params=pltpu.CompilerParams(
            dimension_semantics=("parallel",),
            vmem_limit_bytes=vmem_limit),
        cost_estimate=cost,
    )(x_p, w1p, b1p, w2p, b2p, w3p, b3p)

    return out[:B, :out_dim]


def discriminator_forward(x, prepped):
    params, dims = prepped
    try:
        return _forward_impl(x, *params, dims=dims, single_buffer_weights=True)
    except Exception:
        # Fallback to default (double-buffered) weight specs if single
        # buffering is not supported by this JAX/Mosaic build.
        return _forward_impl(x, *params, dims=dims, single_buffer_weights=False)


def init_params(key, in_size):
    """Deterministic synthetic parameters matching nn.Linear shapes.

    PyTorch stores Linear weights as (out, in); we store them transposed
    (in, out) so the kernel does x @ W + b (same math as x @ W_pt.T + b).
    """
    hid = in_size // 2
    k1, k2, k3, k4, k5, k6 = jax.random.split(key, 6)
    s1 = 1.0 / jnp.sqrt(in_size)
    s2 = 1.0 / jnp.sqrt(in_size)
    s3 = 1.0 / jnp.sqrt(hid)
    w1 = jax.random.uniform(k1, (in_size, in_size), jnp.float32, -s1, s1)
    b1 = jax.random.uniform(k2, (1, in_size), jnp.float32, -s1, s1)
    w2 = jax.random.uniform(k3, (in_size, hid), jnp.float32, -s2, s2)
    b2 = jax.random.uniform(k4, (1, hid), jnp.float32, -s2, s2)
    w3 = jax.random.uniform(k5, (hid, 2), jnp.float32, -s3, s3)
    b3 = jax.random.uniform(k6, (1, 2), jnp.float32, -s3, s3)
    return w1, b1, w2, b2, w3, b3


def reference_forward(x, w1, b1, w2, b2, w3, b3, compute_dtype=jnp.float32):
    cd = compute_dtype
    h1 = jnp.maximum(
        jnp.dot(x.astype(cd), w1.astype(cd),
                preferred_element_type=jnp.float32) + b1, 0.0)
    h2 = jnp.maximum(
        jnp.dot(h1.astype(cd), w2.astype(cd),
                preferred_element_type=jnp.float32) + b2, 0.0)
    return jnp.dot(h2.astype(cd), w3.astype(cd),
                   preferred_element_type=jnp.float32) + b3


if __name__ == "__main__":
    key = jax.random.PRNGKey(0)
    kx, kp = jax.random.split(key)

    B, in_size = 16, 32  # small demo shapes; hid = 16, 2 logits
    x = jax.random.normal(kx, (B, in_size), jnp.float32)
    params = init_params(kp, in_size)

    prepped = prepare_params(*params)          # one-time pad + bf16 cast
    out = discriminator_forward(x, prepped)
    out = jax.block_until_ready(out)
    assert out.shape == (B, 2)

    # Exact-math check against a reference that applies the same bf16 operand
    # quantization (f32 accumulation), plus a loose check vs pure f32 math.
    ref_bf16 = reference_forward(x, *params, compute_dtype=jnp.bfloat16)
    ref_f32 = reference_forward(x, *params, compute_dtype=jnp.float32)
    assert jnp.allclose(out, ref_bf16, atol=1e-3, rtol=1e-3), \
        "mismatch vs bf16-matched reference"
    assert jnp.allclose(out, ref_f32, atol=5e-2, rtol=5e-2), \
        "mismatch vs f32 reference"

    print("KERNEL_OK")
</pallas_src>

<mosaic_0001>
module attributes {stable_mosaic.version = 11 : i64} {
  func.func @_discriminator_kernel(%arg0: i32, %arg1: memref<16x256xbf16, #tpu.memory_space<vmem>>, %arg2: memref<256x256xbf16, #tpu.memory_space<vmem>>, %arg3: memref<1x256xf32, #tpu.memory_space<vmem>>, %arg4: memref<256x256xbf16, #tpu.memory_space<vmem>>, %arg5: memref<1x256xf32, #tpu.memory_space<vmem>>, %arg6: memref<256x128xbf16, #tpu.memory_space<vmem>>, %arg7: memref<1x128xf32, #tpu.memory_space<vmem>>, %arg8: memref<16x128xf32, #tpu.memory_space<vmem>>) attributes {dimension_semantics = [#tpu.dimension_semantics<parallel>], iteration_bounds = array<i64: 1>, scalar_prefetch = 0 : i64, scratch_operands = 0 : i64, tpu.core_type = #tpu.core_type<tc>, window_params = [{transform_indices = @transform_0, window_bounds = array<i64: 16, 256>}, {pipeline_mode = #tpu.pipeline_mode<synchronous>, transform_indices = @transform_1, window_bounds = array<i64: 256, 256>}, {pipeline_mode = #tpu.pipeline_mode<synchronous>, transform_indices = @transform_2, window_bounds = array<i64: 1, 256>}, {pipeline_mode = #tpu.pipeline_mode<synchronous>, transform_indices = @transform_3, window_bounds = array<i64: 256, 256>}, {pipeline_mode = #tpu.pipeline_mode<synchronous>, transform_indices = @transform_4, window_bounds = array<i64: 1, 256>}, {pipeline_mode = #tpu.pipeline_mode<synchronous>, transform_indices = @transform_5, window_bounds = array<i64: 256, 128>}, {pipeline_mode = #tpu.pipeline_mode<synchronous>, transform_indices = @transform_6, window_bounds = array<i64: 1, 128>}, {transform_indices = @transform_7, window_bounds = array<i64: 16, 128>}]} {
    %c0 = arith.constant 0 : index
    %c0_0 = arith.constant 0 : index
    %0 = vector.load %arg1[%c0, %c0_0] : memref<16x256xbf16, #tpu.memory_space<vmem>>, vector<16x256xbf16>
    %c0_1 = arith.constant 0 : index
    %c0_2 = arith.constant 0 : index
    %1 = vector.load %arg2[%c0_1, %c0_2] : memref<256x256xbf16, #tpu.memory_space<vmem>>, vector<256x256xbf16>
    %cst = arith.constant dense<0.000000e+00> : vector<16x256xf32>
    %2 = tpu.matmul %0, %1, %cst {dimension_numbers = #tpu.dot_dimension_numbers<[1], [0], [0], [1], [0, 0, 1, 1], [], []>} : vector<16x256xbf16>, vector<256x256xbf16>, vector<16x256xf32> -> vector<16x256xf32>
    %c0_3 = arith.constant 0 : index
    %c0_4 = arith.constant 0 : index
    %3 = vector.load %arg3[%c0_3, %c0_4] : memref<1x256xf32, #tpu.memory_space<vmem>>, vector<1x256xf32>
    %4 = vector.broadcast %3 : vector<1x256xf32> to vector<16x256xf32>
    %5 = arith.addf %2, %4 : vector<16x256xf32>
    %cst_5 = arith.constant 0.000000e+00 : f32
    %6 = vector.broadcast %cst_5 : f32 to vector<16x256xf32>
    %7 = arith.maximumf %5, %6 : vector<16x256xf32>
    %8 = arith.truncf %7 : vector<16x256xf32> to vector<16x256xbf16>
    %c0_6 = arith.constant 0 : index
    %c0_7 = arith.constant 0 : index
    %9 = vector.load %arg4[%c0_6, %c0_7] : memref<256x256xbf16, #tpu.memory_space<vmem>>, vector<256x256xbf16>
    %cst_8 = arith.constant dense<0.000000e+00> : vector<16x256xf32>
    %10 = tpu.matmul %8, %9, %cst_8 {dimension_numbers = #tpu.dot_dimension_numbers<[1], [0], [0], [1], [0, 0, 1, 1], [], []>} : vector<16x256xbf16>, vector<256x256xbf16>, vector<16x256xf32> -> vector<16x256xf32>
    %c0_9 = arith.constant 0 : index
    %c0_10 = arith.constant 0 : index
    %11 = vector.load %arg5[%c0_9, %c0_10] : memref<1x256xf32, #tpu.memory_space<vmem>>, vector<1x256xf32>
    %12 = vector.broadcast %11 : vector<1x256xf32> to vector<16x256xf32>
    %13 = arith.addf %10, %12 : vector<16x256xf32>
    %cst_11 = arith.constant 0.000000e+00 : f32
    %14 = vector.broadcast %cst_11 : f32 to vector<16x256xf32>
    %15 = arith.maximumf %13, %14 : vector<16x256xf32>
    %16 = arith.truncf %15 : vector<16x256xf32> to vector<16x256xbf16>
    %c0_12 = arith.constant 0 : index
    %c0_13 = arith.constant 0 : index
    %17 = vector.load %arg6[%c0_12, %c0_13] : memref<256x128xbf16, #tpu.memory_space<vmem>>, vector<256x128xbf16>
    %cst_14 = arith.constant dense<0.000000e+00> : vector<16x128xf32>
    %18 = tpu.matmul %16, %17, %cst_14 {dimension_numbers = #tpu.dot_dimension_numbers<[1], [0], [0], [1], [0, 0, 1, 1], [], []>} : vector<16x256xbf16>, vector<256x128xbf16>, vector<16x128xf32> -> vector<16x128xf32>
    %c0_15 = arith.constant 0 : index
    %c0_16 = arith.constant 0 : index
    %19 = vector.load %arg7[%c0_15, %c0_16] : memref<1x128xf32, #tpu.memory_space<vmem>>, vector<1x128xf32>
    %20 = vector.broadcast %19 : vector<1x128xf32> to vector<16x128xf32>
    %21 = arith.addf %18, %20 : vector<16x128xf32>
    %c0_17 = arith.constant 0 : index
    %c0_18 = arith.constant 0 : index
    %22 = vector.load %arg8[%c0_17, %c0_18] : memref<16x128xf32, #tpu.memory_space<vmem>>, vector<16x128xf32>
    tpu.vector_store %arg8[%c0_17, %c0_18], %21 {strides = array<i32>} : memref<16x128xf32, #tpu.memory_space<vmem>>, vector<16x128xf32>,
    return
  }
  func.func @transform_0(%arg0: i32) -> (i32, i32) {
    %c0_i32 = arith.constant 0 : i32
    %c0_i32_0 = arith.constant 0 : i32
    return %arg0, %c0_i32 : i32, i32
  }
  func.func @transform_1(%arg0: i32) -> (i32, i32) {
    %c0_i32 = arith.constant 0 : i32
    %c0_i32_0 = arith.constant 0 : i32
    %c0_i32_1 = arith.constant 0 : i32
    return %c0_i32, %c0_i32_0 : i32, i32
  }
  func.func @transform_2(%arg0: i32) -> (i32, i32) {
    %c0_i32 = arith.constant 0 : i32
    %c0_i32_0 = arith.constant 0 : i32
    %c0_i32_1 = arith.constant 0 : i32
    return %c0_i32, %c0_i32_0 : i32, i32
  }
  func.func @transform_3(%arg0: i32) -> (i32, i32) {
    %c0_i32 = arith.constant 0 : i32
    %c0_i32_0 = arith.constant 0 : i32
    %c0_i32_1 = arith.constant 0 : i32
    return %c0_i32, %c0_i32_0 : i32, i32
  }
  func.func @transform_4(%arg0: i32) -> (i32, i32) {
    %c0_i32 = arith.constant 0 : i32
    %c0_i32_0 = arith.constant 0 : i32
    %c0_i32_1 = arith.constant 0 : i32
    return %c0_i32, %c0_i32_0 : i32, i32
  }
  func.func @transform_5(%arg0: i32) -> (i32, i32) {
    %c0_i32 = arith.constant 0 : i32
    %c0_i32_0 = arith.constant 0 : i32
    %c0_i32_1 = arith.constant 0 : i32
    return %c0_i32, %c0_i32_0 : i32, i32
  }
  func.func @transform_6(%arg0: i32) -> (i32, i32) {
    %c0_i32 = arith.constant 0 : i32
    %c0_i32_0 = arith.constant 0 : i32
    %c0_i32_1 = arith.constant 0 : i32
    return %c0_i32, %c0_i32_0 : i32, i32
  }
  func.func @transform_7(%arg0: i32) -> (i32, i32) {
    %c0_i32 = arith.constant 0 : i32
    %c0_i32_0 = arith.constant 0 : i32
    return %arg0, %c0_i32 : i32, i32
  }
}

module attributes {stable_mosaic.version = 11 : i64} {
  func.func @_discriminator_kernel(%arg0: i32, %arg1: memref<16x256xbf16, #tpu.memory_space<vmem>>, %arg2: memref<256x256xbf16, #tpu.memory_space<vmem>>, %arg3: memref<1x256xf32, #tpu.memory_space<vmem>>, %arg4: memref<256x256xbf16, #tpu.memory_space<vmem>>, %arg5: memref<1x256xf32, #tpu.memory_space<vmem>>, %arg6: memref<256x128xbf16, #tpu.memory_space<vmem>>, %arg7: memref<1x128xf32, #tpu.memory_space<vmem>>, %arg8: memref<16x128xf32, #tpu.memory_space<vmem>>) attributes {dimension_semantics = [#tpu.dimension_semantics<parallel>], iteration_bounds = array<i64: 1>, scalar_prefetch = 0 : i64, scratch_operands = 0 : i64, tpu.core_type = #tpu.core_type<tc>, window_params = [{transform_indices = @transform_0, window_bounds = array<i64: 16, 256>}, {pipeline_mode = #tpu.pipeline_mode<synchronous>, transform_indices = @transform_1, window_bounds = array<i64: 256, 256>}, {pipeline_mode = #tpu.pipeline_mode<synchronous>, transform_indices = @transform_2, window_bounds = array<i64: 1, 256>}, {pipeline_mode = #tpu.pipeline_mode<synchronous>, transform_indices = @transform_3, window_bounds = array<i64: 256, 256>}, {pipeline_mode = #tpu.pipeline_mode<synchronous>, transform_indices = @transform_4, window_bounds = array<i64: 1, 256>}, {pipeline_mode = #tpu.pipeline_mode<synchronous>, transform_indices = @transform_5, window_bounds = array<i64: 256, 128>}, {pipeline_mode = #tpu.pipeline_mode<synchronous>, transform_indices = @transform_6, window_bounds = array<i64: 1, 128>}, {transform_indices = @transform_7, window_bounds = array<i64: 16, 128>}]} {
    %c0 = arith.constant 0 : index
    %c0_0 = arith.constant 0 : index
    %0 = vector.load %arg1[%c0, %c0_0] : memref<16x256xbf16, #tpu.memory_space<vmem>>, vector<16x256xbf16>
    %c0_1 = arith.constant 0 : index
    %c0_2 = arith.constant 0 : index
    %1 = vector.load %arg2[%c0_1, %c0_2] : memref<256x256xbf16, #tpu.memory_space<vmem>>, vector<256x256xbf16>
    %cst = arith.constant dense<0.000000e+00> : vector<16x256xf32>
    %2 = tpu.matmul %0, %1, %cst {dimension_numbers = #tpu.dot_dimension_numbers<[1], [0], [0], [1], [0, 0, 1, 1], [], []>} : vector<16x256xbf16>, vector<256x256xbf16>, vector<16x256xf32> -> vector<16x256xf32>
    %c0_3 = arith.constant 0 : index
    %c0_4 = arith.constant 0 : index
    %3 = vector.load %arg3[%c0_3, %c0_4] : memref<1x256xf32, #tpu.memory_space<vmem>>, vector<1x256xf32>
    %4 = vector.broadcast %3 : vector<1x256xf32> to vector<16x256xf32>
    %5 = arith.addf %2, %4 : vector<16x256xf32>
    %cst_5 = arith.constant 0.000000e+00 : f32
    %6 = vector.broadcast %cst_5 : f32 to vector<16x256xf32>
    %7 = arith.maximumf %5, %6 : vector<16x256xf32>
    %8 = arith.truncf %7 : vector<16x256xf32> to vector<16x256xbf16>
    %c0_6 = arith.constant 0 : index
    %c0_7 = arith.constant 0 : index
    %9 = vector.load %arg4[%c0_6, %c0_7] : memref<256x256xbf16, #tpu.memory_space<vmem>>, vector<256x256xbf16>
    %cst_8 = arith.constant dense<0.000000e+00> : vector<16x256xf32>
    %10 = tpu.matmul %8, %9, %cst_8 {dimension_numbers = #tpu.dot_dimension_numbers<[1], [0], [0], [1], [0, 0, 1, 1], [], []>} : vector<16x256xbf16>, vector<256x256xbf16>, vector<16x256xf32> -> vector<16x256xf32>
    %c0_9 = arith.constant 0 : index
    %c0_10 = arith.constant 0 : index
    %11 = vector.load %arg5[%c0_9, %c0_10] : memref<1x256xf32, #tpu.memory_space<vmem>>, vector<1x256xf32>
    %12 = vector.broadcast %11 : vector<1x256xf32> to vector<16x256xf32>
    %13 = arith.addf %10, %12 : vector<16x256xf32>
    %cst_11 = arith.constant 0.000000e+00 : f32
    %14 = vector.broadcast %cst_11 : f32 to vector<16x256xf32>
    %15 = arith.maximumf %13, %14 : vector<16x256xf32>
    %16 = arith.truncf %15 : vector<16x256xf32> to vector<16x256xbf16>
    %c0_12 = arith.constant 0 : index
    %c0_13 = arith.constant 0 : index
    %17 = vector.load %arg6[%c0_12, %c0_13] : memref<256x128xbf16, #tpu.memory_space<vmem>>, vector<256x128xbf16>
    %cst_14 = arith.constant dense<0.000000e+00> : vector<16x128xf32>
    %18 = tpu.matmul %16, %17, %cst_14 {dimension_numbers = #tpu.dot_dimension_numbers<[1], [0], [0], [1], [0, 0, 1, 1], [], []>} : vector<16x256xbf16>, vector<256x128xbf16>, vector<16x128xf32> -> vector<16x128xf32>
    %c0_15 = arith.constant 0 : index
    %c0_16 = arith.constant 0 : index
    %19 = vector.load %arg7[%c0_15, %c0_16] : memref<1x128xf32, #tpu.memory_space<vmem>>, vector<1x128xf32>
    %20 = vector.broadcast %19 : vector<1x128xf32> to vector<16x128xf32>
    %21 = arith.addf %18, %20 : vector<16x128xf32>
    %c0_17 = arith.constant 0 : index
    %c0_18 = arith.constant 0 : index
    %22 = vector.load %arg8[%c0_17, %c0_18] : memref<16x128xf32, #tpu.memory_space<vmem>>, vector<16x128xf32>
    tpu.vector_store %arg8[%c0_17, %c0_18], %21 {strides = array<i32>} : memref<16x128xf32, #tpu.memory_space<vmem>>, vector<16x128xf32>,
    return
  }
  func.func @transform_0(%arg0: i32) -> (i32, i32) {
    %c0_i32 = arith.constant 0 : i32
    %c0_i32_0 = arith.constant 0 : i32
    return %arg0, %c0_i32 : i32, i32
  }
  func.func @transform_1(%arg0: i32) -> (i32, i32) {
    %c0_i32 = arith.constant 0 : i32
    %c0_i32_0 = arith.constant 0 : i32
    %c0_i32_1 = arith.constant 0 : i32
    return %c0_i32, %c0_i32_0 : i32, i32
  }
  func.func @transform_2(%arg0: i32) -> (i32, i32) {
    %c0_i32 = arith.constant 0 : i32
    %c0_i32_0 = arith.constant 0 : i32
    %c0_i32_1 = arith.constant 0 : i32
    return %c0_i32, %c0_i32_0 : i32, i32
  }
  func.func @transform_3(%arg0: i32) -> (i32, i32) {
    %c0_i32 = arith.constant 0 : i32
    %c0_i32_0 = arith.constant 0 : i32
    %c0_i32_1 = arith.constant 0 : i32
    return %c0_i32, %c0_i32_0 : i32, i32
  }
  func.func @transform_4(%arg0: i32) -> (i32, i32) {
    %c0_i32 = arith.constant 0 : i32
    %c0_i32_0 = arith.constant 0 : i32
    %c0_i32_1 = arith.constant 0 : i32
    return %c0_i32, %c0_i32_0 : i32, i32
  }
  func.func @transform_5(%arg0: i32) -> (i32, i32) {
    %c0_i32 = arith.constant 0 : i32
    %c0_i32_0 = arith.constant 0 : i32
    %c0_i32_1 = arith.constant 0 : i32
    return %c0_i32, %c0_i32_0 : i32, i32
  }
  func.func @transform_6(%arg0: i32) -> (i32, i32) {
    %c0_i32 = arith.constant 0 : i32
    %c0_i32_0 = arith.constant 0 : i32
    %c0_i32_1 = arith.constant 0 : i32
    return %c0_i32, %c0_i32_0 : i32, i32
  }
  func.func @transform_7(%arg0: i32) -> (i32, i32) {
    %c0_i32 = arith.constant 0 : i32
    %c0_i32_0 = arith.constant 0 : i32
    return %arg0, %c0_i32 : i32, i32
  }
}

</mosaic_0001>

<bundles_post_ra>
// kernel: _forward_impl.1
= control target key start
LH: loop header
LB: loop body
LE: loop exit
PB: predicated region body
PF: predicated region fallthrough
CT: control target
= control target key end

     0   :  { %12 = vsyncpa [#allocation3], 0  ;;  %s1138_s0 = inlined_call_operand.vmem [shape: bf16[16,256], index: 0, kind: input, shape index: {}]   ;;  %s1139_s1 = inlined_call_operand.hbm [shape: bf16[256,256], index: 1, kind: input, shape index: {}]   ;;  %s1140_s2 = inlined_call_operand.vmem [shape: f32[1,256], index: 2, kind: input, shape index: {}]   ;;  %s1141_s3 = inlined_call_operand.hbm [shape: bf16[256,256], index: 3, kind: input, shape index: {}]   ;;  %s1142_s4 = inlined_call_operand.vmem [shape: f32[1,256], index: 4, kind: input, shape index: {}]   ;;  %s1143_s5 = inlined_call_operand.hbm [shape: bf16[256,128], index: 5, kind: input, shape index: {}]   ;;  %s1144_s6 = inlined_call_operand.vmem [shape: f32[1,128], index: 6, kind: input, shape index: {}]   ;;  %s1145_s7 = inlined_call_operand.vmem [shape: f32[16,128], index: 7, kind: output, shape index: {}]  }
   0x1   :  { %13 = vsyncpa [#allocation5], 0  ;;  %s1061_s24 = smov [#allocation4]   ;;  %s1062_s26 = smov [#allocation2]  }
   0x2   :  { %s35_s25 = sshll.u32 %s1061_s24, 4  ;;  %s21_s27 = sshll.u32 %s1062_s26, 4  ;;  %s36_s25 = int_to_ptr.vmem [resolvable:$true] %s35_s25  ;;  %s22_s27 = int_to_ptr.vmem [resolvable:$true] %s21_s27 }
   0x3   :  { %s1005_s28 = scalar_lea.vmem %s36_s25, 4096  ;;  %p1010_p1 = scmp.lt.s32.totalorder %s36_s25, %s36_s25 }
   0x4   :  { %p1006_p0 = scmp.ne.s32.totalorder %s36_s25, %s1005_s28  ;;  %p1011_p2 = scmp.lt.s32.totalorder %s1005_s28, %s1005_s28 }
   0x6   :  { %p1012_p3 = por %p1011_p2, %p1010_p1 }
   0x8   :  { %p1013_p4 = pnand %p1012_p3, %p1006_p0 }
   0xa   :  { %1016 = shalt.err (!%p1013_p4)
}
   0xb   :  { %s1063_s29 = smov 128   ;;  %s1064_s30 = smov 8  }
   0xc   :  { %41 = dma.hbm_to_vmem [thread:$0]  %s1141_s3, 4096, %s36_s25, [#allocation5], %s1063_s29, %s1063_s29, %s1064_s30  }
   0xd   :  { %s1025_s10 = scalar_lea.vmem %s22_s27, 4096  ;;  %p1030_p6 = scmp.lt.s32.totalorder %s22_s27, %s22_s27 }
   0xe   :  { %p1026_p5 = scmp.ne.s32.totalorder %s22_s27, %s1025_s10  ;;  %p1031_p7 = scmp.lt.s32.totalorder %s1025_s10, %s1025_s10 }
  0x10   :  { %p1032_p8 = por %p1031_p7, %p1030_p6 }
  0x12   :  { %p1033_p9 = pnand %p1032_p8, %p1026_p5 }
  0x14   :  { %1036 = shalt.err (!%p1033_p9)
}
  0x15   :  { %27 = dma.hbm_to_vmem [thread:$0]  %s1139_s1, 4096, %s22_s27, [#allocation3], %s1063_s29, %s1063_s29, %s1064_s30  }
  0x16   :  { %s1065_s13 = smov [#allocation6]  }
  0x17   :  { %s49_s14 = sshll.u32 %s1065_s13, 4  ;;  %s50_s14 = int_to_ptr.vmem [resolvable:$true] %s49_s14 }
  0x18   :  { %s1045_s15 = scalar_lea.vmem %s50_s14, 2048  ;;  %p1050_p11 = scmp.lt.s32.totalorder %s50_s14, %s50_s14 }
  0x19   :  { %p1046_p10 = scmp.ne.s32.totalorder %s50_s14, %s1045_s15  ;;  %p1051_p12 = scmp.lt.s32.totalorder %s1045_s15, %s1045_s15 }
  0x1b   :  { %p1052_p13 = por %p1051_p12, %p1050_p11 }
  0x1d   :  { %p1053_p0 = pnand %p1052_p13, %p1046_p10 }
  0x1f   :  { %1056 = shalt.err (!%p1053_p0)
}
  0x20   :  { %s1066_s3 = smov 64   ;;  %s1067_s16 = smov 4  }
  0x21   :  { %55 = dma.hbm_to_vmem [thread:$0]  %s1143_s5, 2048, %s50_s14, [#allocation5], %s1066_s3, %s1066_s3, %s1067_s16  }
  0x22   :  { %1057 = dma.done.wait [#allocation3], 4096  }
  0x23   :  { %1058 = vsyncadd [#allocation3], 4294963200 }
  0x24   :  { %1059 = dma.done.wait [#allocation5], 6144  }
  0x25   :  { %1060 = vsyncadd [#allocation5], 4294961152  ;;  %v882_v0 = vld [vmem:[#allocation2 + $0x74] ss:$8 sps:$4 sm:$0xff]   ;;  %v884_v1 = vld [vmem:[#allocation2 + $0x70] ss:$8 sps:$4 sm:$0xff]  }
  0x26   :  { %284 = vmatprep.subr.bf16.mxu0 %v882_v0  ;;  %v885_v2 = vld [vmem:[#allocation2 + $0x64] ss:$8 sps:$4 sm:$0xff]   ;;  %v887_v3 = vld [vmem:[#allocation2 + $0x60] ss:$8 sps:$4 sm:$0xff]   ;;  %v888_v4 = vld [vmem:[#allocation2 + $0x54] ss:$8 sps:$4 sm:$0xff]  }
  0x27   :  { %285 = vmatpush1.bf16.msra.mxu0 %v884_v1  ;;  %v890_v5 = vld [vmem:[#allocation2 + $0x50] ss:$8 sps:$4 sm:$0xff]   ;;  %v891_v6 = vld [vmem:[#allocation2 + $0x44] ss:$8 sps:$4 sm:$0xff]   ;;  %v893_v7 = vld [vmem:[#allocation2 + $0x40] ss:$8 sps:$4 sm:$0xff]  }
  0x28   :  { %286 = vmatprep.subr.bf16.mxu0 %v885_v2  ;;  %v894_v8 = vld [vmem:[#allocation2 + $0x34] ss:$8 sps:$4 sm:$0xff]   ;;  %v896_v9 = vld [vmem:[#allocation2 + $0x30] ss:$8 sps:$4 sm:$0xff]   ;;  %v897_v10 = vld [vmem:[#allocation2 + $0x24] ss:$8 sps:$4 sm:$0xff]  }
  0x29   :  { %v899_v11 = vld [vmem:[#allocation2 + $0x20] ss:$8 sps:$4 sm:$0xff]   ;;  %v900_v12 = vld [vmem:[#allocation2 + $0x14] ss:$8 sps:$4 sm:$0xff]   ;;  %v902_v13 = vld [vmem:[#allocation2 + $0x10] ss:$8 sps:$4 sm:$0xff]  }
  0x2a   :  { %v903_v14 = vld [vmem:[#allocation2 + $0x4] ss:$8 sps:$4 sm:$0xff]   ;;  %v933_v16 = vld [vmem:[#allocation4 + $0x74] ss:$8 sps:$4 sm:$0xff]   ;;  %v935_v17 = vld [vmem:[#allocation4 + $0x70] ss:$8 sps:$4 sm:$0xff]  }
  0x2b   :  { %287 = vmatpush1.bf16.msra.mxu0 %v887_v3  ;;  %v932_v15 = vld [vmem:[%s1138_s0 + $0x4] ss:$8 sps:$4 sm:$0xff]   ;;  %537 = vmatprep.subr.bf16.mxu1 %v933_v16  ;;  %v938_v19 = vld [vmem:[#allocation4 + $0x60] ss:$8 sps:$4 sm:$0xff]   ;;  %v939_v21 = vld [vmem:[#allocation4 + $0x54] ss:$8 sps:$4 sm:$0xff]  }
  0x2c   :  { %288 = vmatprep.subr.bf16.mxu0 %v888_v4  ;;  %316 = vmatprep.mubr.bf16.mxu0 %v932_v15  ;;  %v936_v18 = vld [vmem:[#allocation4 + $0x64] ss:$8 sps:$4 sm:$0xff]   ;;  %v905_v20 = vld [vmem:[#allocation2] ss:$8 sps:$4 sm:$0xff]   ;;  %v906_v22 = vld [vmem:[#allocation2 + $0xf4] ss:$8 sps:$4 sm:$0xff]  }
  0x2d   :  { %538 = vmatpush1.bf16.msra.mxu1 %v935_v17  ;;  %v941_v23 = vld [vmem:[#allocation4 + $0x50] ss:$8 sps:$4 sm:$0xff]   ;;  %v942_v25 = vld [vmem:[#allocation4 + $0x44] ss:$8 sps:$4 sm:$0xff]   ;;  %v944_v27 = vld [vmem:[#allocation4 + $0x40] ss:$8 sps:$4 sm:$0xff]  }
  0x2e   :  { %539 = vmatprep.subr.bf16.mxu1 %v936_v18  ;;  %v908_v24 = vld [vmem:[#allocation2 + $0xf0] ss:$8 sps:$4 sm:$0xff]   ;;  %v909_v26 = vld [vmem:[#allocation2 + $0xe4] ss:$8 sps:$4 sm:$0xff]   ;;  %v911_v28 = vld [vmem:[#allocation2 + $0xe0] ss:$8 sps:$4 sm:$0xff]  }
  0x2f   :  { %289 = vmatpush1.bf16.msra.mxu0 %v890_v5  ;;  %v945_v29 = vld [vmem:[#allocation4 + $0x34] ss:$8 sps:$4 sm:$0xff]   ;;  %v914_v31 = vld [vmem:[#allocation2 + $0xd0] ss:$8 sps:$4 sm:$0xff]   ;;  %v915_v33 = vld [vmem:[#allocation2 + $0xc4] ss:$8 sps:$4 sm:$0xff]  }
  0x30   :  { %290 = vmatprep.subr.bf16.mxu0 %v891_v6  ;;  %v912_v30 = vld [vmem:[#allocation2 + $0xd4] ss:$8 sps:$4 sm:$0xff]   ;;  %v947_v32 = vld [vmem:[#allocation4 + $0x30] ss:$8 sps:$4 sm:$0xff]   ;;  %v948_v34 = vld [vmem:[#allocation4 + $0x24] ss:$8 sps:$4 sm:$0xff]  }
  0x31   :  { %540 = vmatpush1.bf16.msra.mxu1 %v938_v19  ;;  %v950_v35 = vld [vmem:[#allocation4 + $0x20] ss:$8 sps:$4 sm:$0xff]   ;;  %v951_v37 = vld [vmem:[#allocation4 + $0x14] ss:$8 sps:$4 sm:$0xff]   ;;  %v953_v39 = vld [vmem:[#allocation4 + $0x10] ss:$8 sps:$4 sm:$0xff]  }
  0x32   :  { %541 = vmatprep.subr.bf16.mxu1 %v939_v21  ;;  %v917_v36 = vld [vmem:[#allocation2 + $0xc0] ss:$8 sps:$4 sm:$0xff]   ;;  %v918_v38 = vld [vmem:[#allocation2 + $0xb4] ss:$8 sps:$4 sm:$0xff]   ;;  %v920_v40 = vld [vmem:[#allocation2 + $0xb0] ss:$8 sps:$4 sm:$0xff]  }
  0x33   :  { %291 = vmatpush1.bf16.msra.mxu0 %v893_v7  ;;  %v954_v41 = vld [vmem:[#allocation4 + $0x4] ss:$8 sps:$4 sm:$0xff]   ;;  %v956_v43 = vld [vmem:[#allocation4] ss:$8 sps:$4 sm:$0xff]   ;;  %v957_v45 = vld [vmem:[#allocation4 + $0xf4] ss:$8 sps:$4 sm:$0xff]  }
  0x34   :  { %292 = vmatprep.subr.bf16.mxu0 %v894_v8  ;;  %v921_v42 = vld [vmem:[#allocation2 + $0xa4] ss:$8 sps:$4 sm:$0xff]   ;;  %v923_v44 = vld [vmem:[#allocation2 + $0xa0] ss:$8 sps:$4 sm:$0xff]   ;;  %v924_v46 = vld [vmem:[#allocation2 + $0x94] ss:$8 sps:$4 sm:$0xff]  }
  0x35   :  { %542 = vmatpush1.bf16.msra.mxu1 %v941_v23  ;;  %v959_v47 = vld [vmem:[#allocation4 + $0xf0] ss:$8 sps:$4 sm:$0xff]   ;;  %v960_v49 = vld [vmem:[#allocation4 + $0xe4] ss:$8 sps:$4 sm:$0xff]   ;;  %v962_v51 = vld [vmem:[#allocation4 + $0xe0] ss:$8 sps:$4 sm:$0xff]  }
  0x36   :  { %543 = vmatprep.subr.bf16.mxu1 %v942_v25  ;;  %v926_v48 = vld [vmem:[#allocation2 + $0x90] ss:$8 sps:$4 sm:$0xff]   ;;  %v927_v50 = vld [vmem:[#allocation2 + $0x84] ss:$8 sps:$4 sm:$0xff]   ;;  %v929_v52 = vld [vmem:[#allocation2 + $0x80] ss:$8 sps:$4 sm:$0xff]  }
  0x37   :  { %293 = vmatpush1.bf16.msra.mxu0 %v896_v9  ;;  %v963_v53 = vld [vmem:[#allocation4 + $0xd4] ss:$8 sps:$4 sm:$0xff]   ;;  %v930_v54 = vld [vmem:[%s1138_s0] ss:$8 sps:$4 sm:$0xff]   ;;  %v965_v55 = vld [vmem:[#allocation4 + $0xd0] ss:$8 sps:$4 sm:$0xff]  }
  0x38   :  { %294 = vmatprep.subr.bf16.mxu0 %v897_v10  ;;  %v966_v56 = vld [vmem:[#allocation4 + $0xc4] ss:$8 sps:$4 sm:$0xff]   ;;  %v968_v57 = vld [vmem:[#allocation4 + $0xc0] ss:$8 sps:$4 sm:$0xff]   ;;  %v969_v58 = vld [vmem:[#allocation4 + $0xb4] ss:$8 sps:$4 sm:$0xff]  }
  0x39   :  { %544 = vmatpush1.bf16.msra.mxu1 %v944_v27  ;;  %v971_v59 = vld [vmem:[#allocation4 + $0xb0] ss:$8 sps:$4 sm:$0xff]   ;;  %v972_v60 = vld [vmem:[#allocation4 + $0xa4] ss:$8 sps:$4 sm:$0xff]   ;;  %v974_v61 = vld [vmem:[#allocation4 + $0xa0] ss:$8 sps:$4 sm:$0xff]  }
  0x3a   :  { %545 = vmatprep.subr.bf16.mxu1 %v945_v29  ;;  %v975_v62 = vld [vmem:[#allocation4 + $0x94] ss:$8 sps:$4 sm:$0xff]   ;;  %v977_v63 = vld [vmem:[#allocation4 + $0x90] ss:$8 sps:$4 sm:$0xff]   ;;  %v978_v0 = vld [vmem:[#allocation4 + $0x84] ss:$8 sps:$4 sm:$0xff]  }
  0x3b   :  { %295 = vmatpush1.bf16.msra.mxu0 %v899_v11  ;;  %v980_v1 = vld [vmem:[#allocation4 + $0x80] ss:$8 sps:$4 sm:$0xff]   ;;  %v981_v2 = vld [vmem:[#allocation6 + $0x78] sm:$0xff]   ;;  %v983_v4 = vld [vmem:[#allocation6 + $0x70] sm:$0xff]  }
  0x3c   :  { %296 = vmatprep.subr.bf16.mxu0 %v900_v12  ;;  %v982_v3 = vld [vmem:[#allocation6 + $0x38] sm:$0xff]   ;;  %v984_v5 = vld [vmem:[#allocation6 + $0x30] sm:$0xff]   ;;  %v985_v6 = vld [vmem:[#allocation6 + $0x68] sm:$0xff]   ;;  %v104_v12 = vlaneseq }
  0x3d   :  { %546 = vmatpush1.bf16.msra.mxu1 %v947_v32  ;;  %v986_v7 = vld [vmem:[#allocation6 + $0x28] sm:$0xff]   ;;  %v987_v8 = vld [vmem:[#allocation6 + $0x60] sm:$0xff]   ;;  %v989_v10 = vld [vmem:[#allocation6 + $0x58] sm:$0xff]  }
  0x3e   :  { %547 = vmatprep.subr.bf16.mxu1 %v948_v34  ;;  %v988_v9 = vld [vmem:[#allocation6 + $0x20] sm:$0xff]   ;;  %v990_v11 = vld [vmem:[#allocation6 + $0x18] sm:$0xff]   ;;  %v992_v34 = vld [vmem:[#allocation6 + $0x10] sm:$0xff]  }
  0x3f   :  { %297 = vmatpush1.bf16.msra.mxu0 %v902_v13  ;;  %v105_v13 = vshrl.u32 %v104_v12, 7  ;;  %v102_v16 = vld [vmem:[%s1140_s2] sm:$0x3] }
  0x40   :  { %298 = vmatprep.subr.bf16.mxu0 %v903_v14 }
  0x41   :  { %548 = vmatpush1.bf16.msra.mxu1 %v950_v35  ;;  %v110_v14 = vsub.s32 1, %v105_v13  ;;  %v106_v15 = vsub.s32 0, %v105_v13  ;;  %v993_v35 = vld [vmem:[#allocation6 + $0x48] sm:$0xff]  }
  0x42   :  { %549 = vmatprep.subr.bf16.mxu1 %v951_v37  ;;  %v995_v37 = vld [vmem:[#allocation6 + $0x40] sm:$0xff]  }
  0x43   :  { %299 = vmatpush1.bf16.msra.mxu0 %v905_v20  ;;  %v111_v18 = vrot.slane %v102_v16, %v110_v14  ;;  %v107_v19 = vrot.slane %v102_v16, %v106_v15 }
  0x44   :  { %300 = vmatprep.subr.bf16.mxu0 %v906_v22 }
  0x45   :  { %550 = vmatpush1.bf16.msra.mxu1 %v953_v39  ;;  %v365_v39 = vld [vmem:[%s1142_s4] sm:$0x3] }
  0x46   :  { %551 = vmatprep.subr.bf16.mxu1 %v954_v41  ;;  %v374_v41 = vrot.slane %v365_v39, %v110_v14 }
  0x47   :  { %301 = vmatpush2.bf16.msra.mxu0 %v908_v24 }
  0x48   :  { %302 = vmatprep.subr.bf16.mxu0 %v909_v26 }
  0x49   :  { %552 = vmatpush1.bf16.msra.mxu1 %v956_v43 }
  0x4a   :  { %553 = vmatprep.subr.bf16.mxu1 %v957_v45 }
  0x4b   :  { %303 = vmatpush2.bf16.msra.mxu0 %v911_v28 }
  0x4c   :  { %304 = vmatprep.subr.bf16.mxu0 %v912_v30 }
  0x4d   :  { %554 = vmatpush2.bf16.msra.mxu1 %v959_v47 }
  0x4e   :  { %555 = vmatprep.subr.bf16.mxu1 %v960_v49 }
  0x4f   :  { %305 = vmatpush2.bf16.msra.mxu0 %v914_v31 }
  0x50   :  { %306 = vmatprep.subr.bf16.mxu0 %v915_v33  ;;  %v991_v33 = vld [vmem:[#allocation6 + $0x50] sm:$0xff]  }
  0x51   :  { %556 = vmatpush2.bf16.msra.mxu1 %v962_v51 }
  0x52   :  { %557 = vmatprep.subr.bf16.mxu1 %v963_v53 }
  0x53   :  { %307 = vmatpush2.bf16.msra.mxu0 %v917_v36  ;;  %v994_v36 = vld [vmem:[#allocation6 + $0x8] sm:$0xff]  }
  0x54   :  { %308 = vmatprep.subr.bf16.mxu0 %v918_v38  ;;  %v996_v38 = vld [vmem:[#allocation6] sm:$0xff]  }
  0x55   :  { %558 = vmatpush2.bf16.msra.mxu1 %v965_v55 }
  0x56   :  { %559 = vmatprep.subr.bf16.mxu1 %v966_v56 }
  0x57   :  { %309 = vmatpush2.bf16.msra.mxu0 %v920_v40 }
  0x58   :  { %310 = vmatprep.subr.bf16.mxu0 %v921_v42  ;;  %v370_v42 = vrot.slane %v365_v39, %v106_v15 }
  0x59   :  { %560 = vmatpush2.bf16.msra.mxu1 %v968_v57  ;;  %v836_v57 = vld [vmem:[%s1144_s6] ss:$0 sm:$0xff] }
  0x5a   :  { %561 = vmatprep.subr.bf16.mxu1 %v969_v58 }
  0x5b   :  { %311 = vmatpush2.bf16.msra.mxu0 %v923_v44 }
  0x5c   :  { %312 = vmatprep.subr.bf16.mxu0 %v924_v46 }
  0x5d   :  { %562 = vmatpush2.bf16.msra.mxu1 %v971_v59 }
  0x5e   :  { %563 = vmatprep.subr.bf16.mxu1 %v972_v60 }
  0x5f   :  { %313 = vmatpush2.bf16.msra.mxu0 %v926_v48 }
  0x60   :  { %314 = vmatprep.subr.bf16.mxu0 %v927_v50 }
  0x61   :  { %564 = vmatpush2.bf16.msra.mxu1 %v974_v61 }
  0x62   :  { %565 = vmatprep.subr.bf16.mxu1 %v975_v62 }
  0x63   :  { %315 = vmatpush2.bf16.msra.mxu0 %v929_v52 }
  0x64   :  { %853 = vmatprep.subr.bf16.mxu0 %v981_v2 }
  0x65   :  { %566 = vmatpush2.bf16.msra.mxu1 %v977_v63 }
  0x66   :  { %317 = vmatmul.mubr.bf16.vlgmr.msra.gmra.mxu0 %v930_v54  ;;  %567 = vmatprep.subr.bf16.mxu1 %v978_v0 }
  0x67   :  { %854 = vmatpush3.bf16.msra.mxu0 %v982_v3 }
  0x68   :  { %855 = vmatprep.subr.bf16.mxu0 %v983_v4 }
  0x69   :  { %568 = vmatpush2.bf16.msra.mxu1 %v980_v1 }
  0x6b   :  { %856 = vmatpush3.bf16.msra.mxu0 %v984_v5 }
  0x6c   :  { %857 = vmatprep.subr.bf16.mxu0 %v985_v6 }
  0x6f   :  { %858 = vmatpush3.bf16.msra.mxu0 %v986_v7 }
  0x70   :  { %859 = vmatprep.subr.bf16.mxu0 %v987_v8 }
  0x73   :  { %860 = vmatpush3.bf16.msra.mxu0 %v988_v9 }
  0x74   :  { %861 = vmatprep.subr.bf16.mxu0 %v989_v10 }
  0x77   :  { %862 = vmatpush3.bf16.msra.mxu0 %v990_v11 }
  0x78   :  { %863 = vmatprep.subr.bf16.mxu0 %v991_v33 }
  0x7b   :  { %864 = vmatpush3.bf16.msra.mxu0 %v992_v34 }
  0x7c   :  { %865 = vmatprep.subr.bf16.mxu0 %v993_v35 }
  0x7f   :  { %866 = vmatpush3.bf16.msra.mxu0 %v994_v36 }
  0x80   :  { %867 = vmatprep.subr.bf16.mxu0 %v995_v37 }
  0x83   :  { %868 = vmatpush3.bf16.msra.mxu0 %v996_v38 }
 0x126   :  { %v318_v17 = vpop.f32.mrf.mxu0 }
 0x127   :  { %v319_v24 = vadd.f32 %v318_v17, %v107_v19 }
 0x128   :  { %v320_v20 = vpop.f32.mrf.mxu0 }
 0x129   :  { %v321_v22 = vadd.f32 %v320_v20, %v111_v18  ;;  %v327_v30 = vmax.f32 %v319_v24, 0.0 }
 0x12a   :  { %v322_v21 = vpop.f32.mrf.mxu0 }
 0x12b   :  { %v323_v23 = vadd.f32 %v322_v21, %v107_v19  ;;  %v328_v28 = vmax.f32 %v321_v22, 0.0 }
 0x12c   :  { %v324_v25 = vpop.f32.mrf.mxu0 }
 0x12d   :  { %v325_v26 = vadd.f32 %v324_v25, %v111_v18  ;;  %v329_v27 = vmax.f32 %v323_v23, 0.0 }
 0x12f   :  { %v330_v29 = vmax.f32 %v325_v26, 0.0  ;;  %v331_v32 = vpack.c.bf16 %v329_v27, %v327_v30 }
 0x131   :  { %v332_v31 = vpack.c.bf16 %v330_v29, %v328_v28 }
 0x133   :  { %569 = vmatprep.mubr.bf16.mxu1 %v332_v31 }
 0x134   :  { %570 = vmatmul.mubr.bf16.vlgmr.msra.gmra.mxu1 %v331_v32 }
 0x1f4   :  { %v571_v40 = vpop.f32.mrf.mxu1 }
 0x1f5   :  { %v572_v47 = vadd.f32 %v571_v40, %v370_v42 }
 0x1f6   :  { %v573_v43 = vpop.f32.mrf.mxu1 }
 0x1f7   :  { %v574_v45 = vadd.f32 %v573_v43, %v374_v41  ;;  %v580_v53 = vmax.f32 %v572_v47, 0.0 }
 0x1f8   :  { %v575_v44 = vpop.f32.mrf.mxu1 }
 0x1f9   :  { %v576_v46 = vadd.f32 %v575_v44, %v370_v42  ;;  %v581_v51 = vmax.f32 %v574_v45, 0.0 }
 0x1fa   :  { %v577_v48 = vpop.f32.mrf.mxu1 }
 0x1fb   :  { %v578_v49 = vadd.f32 %v577_v48, %v374_v41  ;;  %v582_v50 = vmax.f32 %v576_v46, 0.0 }
 0x1fd   :  { %v583_v52 = vmax.f32 %v578_v49, 0.0  ;;  %v584_v55 = vpack.c.bf16 %v582_v50, %v580_v53 }
 0x1ff   :  { %v585_v54 = vpack.c.bf16 %v583_v52, %v581_v51 }
 0x201   :  { %753 = vmatprep.mubr.bf16.mxu0 %v585_v54 }
 0x202   :  { %754 = vmatmul.mubr.bf16.vlgmr.msra.gmra.mxu0 %v584_v55 }
 0x2c2   :  { %v869_v56 = vpop.f32.mrf.mxu0 }
 0x2c4   :  { %v870_v58 = vpop.f32.mrf.mxu0 }
 0x2c5   :  { %v871_v59 = vadd.f32 %v870_v58, %v869_v56 }
 0x2c6   :  { %v872_v60 = vpop.f32.mrf.mxu0 }
 0x2c7   :  { %v756_v61 = vadd.f32 %v871_v59, %v836_v57 }
 0x2c8   :  { %v873_v62 = vpop.f32.mrf.mxu0 }
 0x2c9   :  { %762 = vst [vmem:[%s1145_s7] sm:$0xff] %v756_v61  ;;  %v874_v63 = vadd.f32 %v873_v62, %v872_v60 }
 0x2cb   :  { %v759_v0 = vadd.f32 %v874_v63, %v836_v57 }
 0x2cd   :  { %763 = vst [vmem:[%s1145_s7 + $0x8] sm:$0xff] %v759_v0 }
 0x2ce   :  { %768 = vsyncpa [#allocation3], 1 }
 0x2cf   :  { %769 = vsyncpa [#allocation5], 1 }

// kernel: _forward_impl.1
= control target key start
LH: loop header
LB: loop body
LE: loop exit
PB: predicated region body
PF: predicated region fallthrough
CT: control target
= control target key end

     0   :  { %12 = vsyncpa [#allocation3], 0  ;;  %s1138_s0 = inlined_call_operand.vmem [shape: bf16[16,256], index: 0, kind: input, shape index: {}]   ;;  %s1139_s1 = inlined_call_operand.hbm [shape: bf16[256,256], index: 1, kind: input, shape index: {}]   ;;  %s1140_s2 = inlined_call_operand.vmem [shape: f32[1,256], index: 2, kind: input, shape index: {}]   ;;  %s1141_s3 = inlined_call_operand.hbm [shape: bf16[256,256], index: 3, kind: input, shape index: {}]   ;;  %s1142_s4 = inlined_call_operand.vmem [shape: f32[1,256], index: 4, kind: input, shape index: {}]   ;;  %s1143_s5 = inlined_call_operand.hbm [shape: bf16[256,128], index: 5, kind: input, shape index: {}]   ;;  %s1144_s6 = inlined_call_operand.vmem [shape: f32[1,128], index: 6, kind: input, shape index: {}]   ;;  %s1145_s7 = inlined_call_operand.vmem [shape: f32[16,128], index: 7, kind: output, shape index: {}]  }
   0x1   :  { %13 = vsyncpa [#allocation5], 0  ;;  %s1061_s24 = smov [#allocation4]   ;;  %s1062_s26 = smov [#allocation2]  }
   0x2   :  { %s35_s25 = sshll.u32 %s1061_s24, 4  ;;  %s21_s27 = sshll.u32 %s1062_s26, 4  ;;  %s36_s25 = int_to_ptr.vmem [resolvable:$true] %s35_s25  ;;  %s22_s27 = int_to_ptr.vmem [resolvable:$true] %s21_s27 }
   0x3   :  { %s1005_s28 = scalar_lea.vmem %s36_s25, 4096  ;;  %p1010_p1 = scmp.lt.s32.totalorder %s36_s25, %s36_s25 }
   0x4   :  { %p1006_p0 = scmp.ne.s32.totalorder %s36_s25, %s1005_s28  ;;  %p1011_p2 = scmp.lt.s32.totalorder %s1005_s28, %s1005_s28 }
   0x6   :  { %p1012_p3 = por %p1011_p2, %p1010_p1 }
   0x8   :  { %p1013_p4 = pnand %p1012_p3, %p1006_p0 }
   0xa   :  { %1016 = shalt.err (!%p1013_p4)
}
   0xb   :  { %s1063_s29 = smov 128   ;;  %s1064_s30 = smov 8  }
   0xc   :  { %41 = dma.hbm_to_vmem [thread:$0]  %s1141_s3, 4096, %s36_s25, [#allocation5], %s1063_s29, %s1063_s29, %s1064_s30  }
   0xd   :  { %s1025_s10 = scalar_lea.vmem %s22_s27, 4096  ;;  %p1030_p6 = scmp.lt.s32.totalorder %s22_s27, %s22_s27 }
   0xe   :  { %p1026_p5 = scmp.ne.s32.totalorder %s22_s27, %s1025_s10  ;;  %p1031_p7 = scmp.lt.s32.totalorder %s1025_s10, %s1025_s10 }
  0x10   :  { %p1032_p8 = por %p1031_p7, %p1030_p6 }
  0x12   :  { %p1033_p9 = pnand %p1032_p8, %p1026_p5 }
  0x14   :  { %1036 = shalt.err (!%p1033_p9)
}
  0x15   :  { %27 = dma.hbm_to_vmem [thread:$0]  %s1139_s1, 4096, %s22_s27, [#allocation3], %s1063_s29, %s1063_s29, %s1064_s30  }
  0x16   :  { %s1065_s13 = smov [#allocation6]  }
  0x17   :  { %s49_s14 = sshll.u32 %s1065_s13, 4  ;;  %s50_s14 = int_to_ptr.vmem [resolvable:$true] %s49_s14 }
  0x18   :  { %s1045_s15 = scalar_lea.vmem %s50_s14, 2048  ;;  %p1050_p11 = scmp.lt.s32.totalorder %s50_s14, %s50_s14 }
  0x19   :  { %p1046_p10 = scmp.ne.s32.totalorder %s50_s14, %s1045_s15  ;;  %p1051_p12 = scmp.lt.s32.totalorder %s1045_s15, %s1045_s15 }
  0x1b   :  { %p1052_p13 = por %p1051_p12, %p1050_p11 }
  0x1d   :  { %p1053_p0 = pnand %p1052_p13, %p1046_p10 }
  0x1f   :  { %1056 = shalt.err (!%p1053_p0)
}
  0x20   :  { %s1066_s3 = smov 64   ;;  %s1067_s16 = smov 4  }
  0x21   :  { %55 = dma.hbm_to_vmem [thread:$0]  %s1143_s5, 2048, %s50_s14, [#allocation5], %s1066_s3, %s1066_s3, %s1067_s16  }
  0x22   :  { %1057 = dma.done.wait [#allocation3], 4096  }
  0x23   :  { %1058 = vsyncadd [#allocation3], 4294963200 }
  0x24   :  { %1059 = dma.done.wait [#allocation5], 6144  }
  0x25   :  { %1060 = vsyncadd [#allocation5], 4294961152  ;;  %v882_v0 = vld [vmem:[#allocation2 + $0x74] ss:$8 sps:$4 sm:$0xff]   ;;  %v884_v1 = vld [vmem:[#allocation2 + $0x70] ss:$8 sps:$4 sm:$0xff]  }
  0x26   :  { %284 = vmatprep.subr.bf16.mxu0 %v882_v0  ;;  %v885_v2 = vld [vmem:[#allocation2 + $0x64] ss:$8 sps:$4 sm:$0xff]   ;;  %v887_v3 = vld [vmem:[#allocation2 + $0x60] ss:$8 sps:$4 sm:$0xff]   ;;  %v888_v4 = vld [vmem:[#allocation2 + $0x54] ss:$8 sps:$4 sm:$0xff]  }
  0x27   :  { %285 = vmatpush1.bf16.msra.mxu0 %v884_v1  ;;  %v890_v5 = vld [vmem:[#allocation2 + $0x50] ss:$8 sps:$4 sm:$0xff]   ;;  %v891_v6 = vld [vmem:[#allocation2 + $0x44] ss:$8 sps:$4 sm:$0xff]   ;;  %v893_v7 = vld [vmem:[#allocation2 + $0x40] ss:$8 sps:$4 sm:$0xff]  }
  0x28   :  { %286 = vmatprep.subr.bf16.mxu0 %v885_v2  ;;  %v894_v8 = vld [vmem:[#allocation2 + $0x34] ss:$8 sps:$4 sm:$0xff]   ;;  %v896_v9 = vld [vmem:[#allocation2 + $0x30] ss:$8 sps:$4 sm:$0xff]   ;;  %v897_v10 = vld [vmem:[#allocation2 + $0x24] ss:$8 sps:$4 sm:$0xff]  }
  0x29   :  { %v899_v11 = vld [vmem:[#allocation2 + $0x20] ss:$8 sps:$4 sm:$0xff]   ;;  %v900_v12 = vld [vmem:[#allocation2 + $0x14] ss:$8 sps:$4 sm:$0xff]   ;;  %v902_v13 = vld [vmem:[#allocation2 + $0x10] ss:$8 sps:$4 sm:$0xff]  }
  0x2a   :  { %v903_v14 = vld [vmem:[#allocation2 + $0x4] ss:$8 sps:$4 sm:$0xff]   ;;  %v933_v16 = vld [vmem:[#allocation4 + $0x74] ss:$8 sps:$4 sm:$0xff]   ;;  %v935_v17 = vld [vmem:[#allocation4 + $0x70] ss:$8 sps:$4 sm:$0xff]  }
  0x2b   :  { %287 = vmatpush1.bf16.msra.mxu0 %v887_v3  ;;  %v932_v15 = vld [vmem:[%s1138_s0 + $0x4] ss:$8 sps:$4 sm:$0xff]   ;;  %537 = vmatprep.subr.bf16.mxu1 %v933_v16  ;;  %v938_v19 = vld [vmem:[#allocation4 + $0x60] ss:$8 sps:$4 sm:$0xff]   ;;  %v939_v21 = vld [vmem:[#allocation4 + $0x54] ss:$8 sps:$4 sm:$0xff]  }
  0x2c   :  { %288 = vmatprep.subr.bf16.mxu0 %v888_v4  ;;  %316 = vmatprep.mubr.bf16.mxu0 %v932_v15  ;;  %v936_v18 = vld [vmem:[#allocation4 + $0x64] ss:$8 sps:$4 sm:$0xff]   ;;  %v905_v20 = vld [vmem:[#allocation2] ss:$8 sps:$4 sm:$0xff]   ;;  %v906_v22 = vld [vmem:[#allocation2 + $0xf4] ss:$8 sps:$4 sm:$0xff]  }
  0x2d   :  { %538 = vmatpush1.bf16.msra.mxu1 %v935_v17  ;;  %v941_v23 = vld [vmem:[#allocation4 + $0x50] ss:$8 sps:$4 sm:$0xff]   ;;  %v942_v25 = vld [vmem:[#allocation4 + $0x44] ss:$8 sps:$4 sm:$0xff]   ;;  %v944_v27 = vld [vmem:[#allocation4 + $0x40] ss:$8 sps:$4 sm:$0xff]  }
  0x2e   :  { %539 = vmatprep.subr.bf16.mxu1 %v936_v18  ;;  %v908_v24 = vld [vmem:[#allocation2 + $0xf0] ss:$8 sps:$4 sm:$0xff]   ;;  %v909_v26 = vld [vmem:[#allocation2 + $0xe4] ss:$8 sps:$4 sm:$0xff]   ;;  %v911_v28 = vld [vmem:[#allocation2 + $0xe0] ss:$8 sps:$4 sm:$0xff]  }
  0x2f   :  { %289 = vmatpush1.bf16.msra.mxu0 %v890_v5  ;;  %v945_v29 = vld [vmem:[#allocation4 + $0x34] ss:$8 sps:$4 sm:$0xff]   ;;  %v914_v31 = vld [vmem:[#allocation2 + $0xd0] ss:$8 sps:$4 sm:$0xff]   ;;  %v915_v33 = vld [vmem:[#allocation2 + $0xc4] ss:$8 sps:$4 sm:$0xff]  }
  0x30   :  { %290 = vmatprep.subr.bf16.mxu0 %v891_v6  ;;  %v912_v30 = vld [vmem:[#allocation2 + $0xd4] ss:$8 sps:$4 sm:$0xff]   ;;  %v947_v32 = vld [vmem:[#allocation4 + $0x30] ss:$8 sps:$4 sm:$0xff]   ;;  %v948_v34 = vld [vmem:[#allocation4 + $0x24] ss:$8 sps:$4 sm:$0xff]  }
  0x31   :  { %540 = vmatpush1.bf16.msra.mxu1 %v938_v19  ;;  %v950_v35 = vld [vmem:[#allocation4 + $0x20] ss:$8 sps:$4 sm:$0xff]   ;;  %v951_v37 = vld [vmem:[#allocation4 + $0x14] ss:$8 sps:$4 sm:$0xff]   ;;  %v953_v39 = vld [vmem:[#allocation4 + $0x10] ss:$8 sps:$4 sm:$0xff]  }
  0x32   :  { %541 = vmatprep.subr.bf16.mxu1 %v939_v21  ;;  %v917_v36 = vld [vmem:[#allocation2 + $0xc0] ss:$8 sps:$4 sm:$0xff]   ;;  %v918_v38 = vld [vmem:[#allocation2 + $0xb4] ss:$8 sps:$4 sm:$0xff]   ;;  %v920_v40 = vld [vmem:[#allocation2 + $0xb0] ss:$8 sps:$4 sm:$0xff]  }
  0x33   :  { %291 = vmatpush1.bf16.msra.mxu0 %v893_v7  ;;  %v954_v41 = vld [vmem:[#allocation4 + $0x4] ss:$8 sps:$4 sm:$0xff]   ;;  %v956_v43 = vld [vmem:[#allocation4] ss:$8 sps:$4 sm:$0xff]   ;;  %v957_v45 = vld [vmem:[#allocation4 + $0xf4] ss:$8 sps:$4 sm:$0xff]  }
  0x34   :  { %292 = vmatprep.subr.bf16.mxu0 %v894_v8  ;;  %v921_v42 = vld [vmem:[#allocation2 + $0xa4] ss:$8 sps:$4 sm:$0xff]   ;;  %v923_v44 = vld [vmem:[#allocation2 + $0xa0] ss:$8 sps:$4 sm:$0xff]   ;;  %v924_v46 = vld [vmem:[#allocation2 + $0x94] ss:$8 sps:$4 sm:$0xff]  }
  0x35   :  { %542 = vmatpush1.bf16.msra.mxu1 %v941_v23  ;;  %v959_v47 = vld [vmem:[#allocation4 + $0xf0] ss:$8 sps:$4 sm:$0xff]   ;;  %v960_v49 = vld [vmem:[#allocation4 + $0xe4] ss:$8 sps:$4 sm:$0xff]   ;;  %v962_v51 = vld [vmem:[#allocation4 + $0xe0] ss:$8 sps:$4 sm:$0xff]  }
  0x36   :  { %543 = vmatprep.subr.bf16.mxu1 %v942_v25  ;;  %v926_v48 = vld [vmem:[#allocation2 + $0x90] ss:$8 sps:$4 sm:$0xff]   ;;  %v927_v50 = vld [vmem:[#allocation2 + $0x84] ss:$8 sps:$4 sm:$0xff]   ;;  %v929_v52 = vld [vmem:[#allocation2 + $0x80] ss:$8 sps:$4 sm:$0xff]  }
  0x37   :  { %293 = vmatpush1.bf16.msra.mxu0 %v896_v9  ;;  %v963_v53 = vld [vmem:[#allocation4 + $0xd4] ss:$8 sps:$4 sm:$0xff]   ;;  %v930_v54 = vld [vmem:[%s1138_s0] ss:$8 sps:$4 sm:$0xff]   ;;  %v965_v55 = vld [vmem:[#allocation4 + $0xd0] ss:$8 sps:$4 sm:$0xff]  }
  0x38   :  { %294 = vmatprep.subr.bf16.mxu0 %v897_v10  ;;  %v966_v56 = vld [vmem:[#allocation4 + $0xc4] ss:$8 sps:$4 sm:$0xff]   ;;  %v968_v57 = vld [vmem:[#allocation4 + $0xc0] ss:$8 sps:$4 sm:$0xff]   ;;  %v969_v58 = vld [vmem:[#allocation4 + $0xb4] ss:$8 sps:$4 sm:$0xff]  }
  0x39   :  { %544 = vmatpush1.bf16.msra.mxu1 %v944_v27  ;;  %v971_v59 = vld [vmem:[#allocation4 + $0xb0] ss:$8 sps:$4 sm:$0xff]   ;;  %v972_v60 = vld [vmem:[#allocation4 + $0xa4] ss:$8 sps:$4 sm:$0xff]   ;;  %v974_v61 = vld [vmem:[#allocation4 + $0xa0] ss:$8 sps:$4 sm:$0xff]  }
  0x3a   :  { %545 = vmatprep.subr.bf16.mxu1 %v945_v29  ;;  %v975_v62 = vld [vmem:[#allocation4 + $0x94] ss:$8 sps:$4 sm:$0xff]   ;;  %v977_v63 = vld [vmem:[#allocation4 + $0x90] ss:$8 sps:$4 sm:$0xff]   ;;  %v978_v0 = vld [vmem:[#allocation4 + $0x84] ss:$8 sps:$4 sm:$0xff]  }
  0x3b   :  { %295 = vmatpush1.bf16.msra.mxu0 %v899_v11  ;;  %v980_v1 = vld [vmem:[#allocation4 + $0x80] ss:$8 sps:$4 sm:$0xff]   ;;  %v981_v2 = vld [vmem:[#allocation6 + $0x78] sm:$0xff]   ;;  %v983_v4 = vld [vmem:[#allocation6 + $0x70] sm:$0xff]  }
  0x3c   :  { %296 = vmatprep.subr.bf16.mxu0 %v900_v12  ;;  %v982_v3 = vld [vmem:[#allocation6 + $0x38] sm:$0xff]   ;;  %v984_v5 = vld [vmem:[#allocation6 + $0x30] sm:$0xff]   ;;  %v985_v6 = vld [vmem:[#allocation6 + $0x68] sm:$0xff]   ;;  %v104_v12 = vlaneseq }
  0x3d   :  { %546 = vmatpush1.bf16.msra.mxu1 %v947_v32  ;;  %v986_v7 = vld [vmem:[#allocation6 + $0x28] sm:$0xff]   ;;  %v987_v8 = vld [vmem:[#allocation6 + $0x60] sm:$0xff]   ;;  %v989_v10 = vld [vmem:[#allocation6 + $0x58] sm:$0xff]  }
  0x3e   :  { %547 = vmatprep.subr.bf16.mxu1 %v948_v34  ;;  %v988_v9 = vld [vmem:[#allocation6 + $0x20] sm:$0xff]   ;;  %v990_v11 = vld [vmem:[#allocation6 + $0x18] sm:$0xff]   ;;  %v992_v34 = vld [vmem:[#allocation6 + $0x10] sm:$0xff]  }
  0x3f   :  { %297 = vmatpush1.bf16.msra.mxu0 %v902_v13  ;;  %v105_v13 = vshrl.u32 %v104_v12, 7  ;;  %v102_v16 = vld [vmem:[%s1140_s2] sm:$0x3] }
  0x40   :  { %298 = vmatprep.subr.bf16.mxu0 %v903_v14 }
  0x41   :  { %548 = vmatpush1.bf16.msra.mxu1 %v950_v35  ;;  %v110_v14 = vsub.s32 1, %v105_v13  ;;  %v106_v15 = vsub.s32 0, %v105_v13  ;;  %v993_v35 = vld [vmem:[#allocation6 + $0x48] sm:$0xff]  }
  0x42   :  { %549 = vmatprep.subr.bf16.mxu1 %v951_v37  ;;  %v995_v37 = vld [vmem:[#allocation6 + $0x40] sm:$0xff]  }
  0x43   :  { %299 = vmatpush1.bf16.msra.mxu0 %v905_v20  ;;  %v111_v18 = vrot.slane %v102_v16, %v110_v14  ;;  %v107_v19 = vrot.slane %v102_v16, %v106_v15 }
  0x44   :  { %300 = vmatprep.subr.bf16.mxu0 %v906_v22 }
  0x45   :  { %550 = vmatpush1.bf16.msra.mxu1 %v953_v39  ;;  %v365_v39 = vld [vmem:[%s1142_s4] sm:$0x3] }
  0x46   :  { %551 = vmatprep.subr.bf16.mxu1 %v954_v41  ;;  %v374_v41 = vrot.slane %v365_v39, %v110_v14 }
  0x47   :  { %301 = vmatpush2.bf16.msra.mxu0 %v908_v24 }
  0x48   :  { %302 = vmatprep.subr.bf16.mxu0 %v909_v26 }
  0x49   :  { %552 = vmatpush1.bf16.msra.mxu1 %v956_v43 }
  0x4a   :  { %553 = vmatprep.subr.bf16.mxu1 %v957_v45 }
  0x4b   :  { %303 = vmatpush2.bf16.msra.mxu0 %v911_v28 }
  0x4c   :  { %304 = vmatprep.subr.bf16.mxu0 %v912_v30 }
  0x4d   :  { %554 = vmatpush2.bf16.msra.mxu1 %v959_v47 }
  0x4e   :  { %555 = vmatprep.subr.bf16.mxu1 %v960_v49 }
  0x4f   :  { %305 = vmatpush2.bf16.msra.mxu0 %v914_v31 }
  0x50   :  { %306 = vmatprep.subr.bf16.mxu0 %v915_v33  ;;  %v991_v33 = vld [vmem:[#allocation6 + $0x50] sm:$0xff]  }
  0x51   :  { %556 = vmatpush2.bf16.msra.mxu1 %v962_v51 }
  0x52   :  { %557 = vmatprep.subr.bf16.mxu1 %v963_v53 }
  0x53   :  { %307 = vmatpush2.bf16.msra.mxu0 %v917_v36  ;;  %v994_v36 = vld [vmem:[#allocation6 + $0x8] sm:$0xff]  }
  0x54   :  { %308 = vmatprep.subr.bf16.mxu0 %v918_v38  ;;  %v996_v38 = vld [vmem:[#allocation6] sm:$0xff]  }
  0x55   :  { %558 = vmatpush2.bf16.msra.mxu1 %v965_v55 }
  0x56   :  { %559 = vmatprep.subr.bf16.mxu1 %v966_v56 }
  0x57   :  { %309 = vmatpush2.bf16.msra.mxu0 %v920_v40 }
  0x58   :  { %310 = vmatprep.subr.bf16.mxu0 %v921_v42  ;;  %v370_v42 = vrot.slane %v365_v39, %v106_v15 }
  0x59   :  { %560 = vmatpush2.bf16.msra.mxu1 %v968_v57  ;;  %v836_v57 = vld [vmem:[%s1144_s6] ss:$0 sm:$0xff] }
  0x5a   :  { %561 = vmatprep.subr.bf16.mxu1 %v969_v58 }
  0x5b   :  { %311 = vmatpush2.bf16.msra.mxu0 %v923_v44 }
  0x5c   :  { %312 = vmatprep.subr.bf16.mxu0 %v924_v46 }
  0x5d   :  { %562 = vmatpush2.bf16.msra.mxu1 %v971_v59 }
  0x5e   :  { %563 = vmatprep.subr.bf16.mxu1 %v972_v60 }
  0x5f   :  { %313 = vmatpush2.bf16.msra.mxu0 %v926_v48 }
  0x60   :  { %314 = vmatprep.subr.bf16.mxu0 %v927_v50 }
  0x61   :  { %564 = vmatpush2.bf16.msra.mxu1 %v974_v61 }
  0x62   :  { %565 = vmatprep.subr.bf16.mxu1 %v975_v62 }
  0x63   :  { %315 = vmatpush2.bf16.msra.mxu0 %v929_v52 }
  0x64   :  { %853 = vmatprep.subr.bf16.mxu0 %v981_v2 }
  0x65   :  { %566 = vmatpush2.bf16.msra.mxu1 %v977_v63 }
  0x66   :  { %317 = vmatmul.mubr.bf16.vlgmr.msra.gmra.mxu0 %v930_v54  ;;  %567 = vmatprep.subr.bf16.mxu1 %v978_v0 }
  0x67   :  { %854 = vmatpush3.bf16.msra.mxu0 %v982_v3 }
  0x68   :  { %855 = vmatprep.subr.bf16.mxu0 %v983_v4 }
  0x69   :  { %568 = vmatpush2.bf16.msra.mxu1 %v980_v1 }
  0x6b   :  { %856 = vmatpush3.bf16.msra.mxu0 %v984_v5 }
  0x6c   :  { %857 = vmatprep.subr.bf16.mxu0 %v985_v6 }
  0x6f   :  { %858 = vmatpush3.bf16.msra.mxu0 %v986_v7 }
  0x70   :  { %859 = vmatprep.subr.bf16.mxu0 %v987_v8 }
  0x73   :  { %860 = vmatpush3.bf16.msra.mxu0 %v988_v9 }
  0x74   :  { %861 = vmatprep.subr.bf16.mxu0 %v989_v10 }
  0x77   :  { %862 = vmatpush3.bf16.msra.mxu0 %v990_v11 }
  0x78   :  { %863 = vmatprep.subr.bf16.mxu0 %v991_v33 }
  0x7b   :  { %864 = vmatpush3.bf16.msra.mxu0 %v992_v34 }
  0x7c   :  { %865 = vmatprep.subr.bf16.mxu0 %v993_v35 }
  0x7f   :  { %866 = vmatpush3.bf16.msra.mxu0 %v994_v36 }
  0x80   :  { %867 = vmatprep.subr.bf16.mxu0 %v995_v37 }
  0x83   :  { %868 = vmatpush3.bf16.msra.mxu0 %v996_v38 }
 0x126   :  { %v318_v17 = vpop.f32.mrf.mxu0 }
 0x127   :  { %v319_v24 = vadd.f32 %v318_v17, %v107_v19 }
 0x128   :  { %v320_v20 = vpop.f32.mrf.mxu0 }
 0x129   :  { %v321_v22 = vadd.f32 %v320_v20, %v111_v18  ;;  %v327_v30 = vmax.f32 %v319_v24, 0.0 }
 0x12a   :  { %v322_v21 = vpop.f32.mrf.mxu0 }
 0x12b   :  { %v323_v23 = vadd.f32 %v322_v21, %v107_v19  ;;  %v328_v28 = vmax.f32 %v321_v22, 0.0 }
 0x12c   :  { %v324_v25 = vpop.f32.mrf.mxu0 }
 0x12d   :  { %v325_v26 = vadd.f32 %v324_v25, %v111_v18  ;;  %v329_v27 = vmax.f32 %v323_v23, 0.0 }
 0x12f   :  { %v330_v29 = vmax.f32 %v325_v26, 0.0  ;;  %v331_v32 = vpack.c.bf16 %v329_v27, %v327_v30 }
 0x131   :  { %v332_v31 = vpack.c.bf16 %v330_v29, %v328_v28 }
 0x133   :  { %569 = vmatprep.mubr.bf16.mxu1 %v332_v31 }
 0x134   :  { %570 = vmatmul.mubr.bf16.vlgmr.msra.gmra.mxu1 %v331_v32 }
 0x1f4   :  { %v571_v40 = vpop.f32.mrf.mxu1 }
 0x1f5   :  { %v572_v47 = vadd.f32 %v571_v40, %v370_v42 }
 0x1f6   :  { %v573_v43 = vpop.f32.mrf.mxu1 }
 0x1f7   :  { %v574_v45 = vadd.f32 %v573_v43, %v374_v41  ;;  %v580_v53 = vmax.f32 %v572_v47, 0.0 }
 0x1f8   :  { %v575_v44 = vpop.f32.mrf.mxu1 }
 0x1f9   :  { %v576_v46 = vadd.f32 %v575_v44, %v370_v42  ;;  %v581_v51 = vmax.f32 %v574_v45, 0.0 }
 0x1fa   :  { %v577_v48 = vpop.f32.mrf.mxu1 }
 0x1fb   :  { %v578_v49 = vadd.f32 %v577_v48, %v374_v41  ;;  %v582_v50 = vmax.f32 %v576_v46, 0.0 }
 0x1fd   :  { %v583_v52 = vmax.f32 %v578_v49, 0.0  ;;  %v584_v55 = vpack.c.bf16 %v582_v50, %v580_v53 }
 0x1ff   :  { %v585_v54 = vpack.c.bf16 %v583_v52, %v581_v51 }
 0x201   :  { %753 = vmatprep.mubr.bf16.mxu0 %v585_v54 }
 0x202   :  { %754 = vmatmul.mubr.bf16.vlgmr.msra.gmra.mxu0 %v584_v55 }
 0x2c2   :  { %v869_v56 = vpop.f32.mrf.mxu0 }
 0x2c4   :  { %v870_v58 = vpop.f32.mrf.mxu0 }
 0x2c5   :  { %v871_v59 = vadd.f32 %v870_v58, %v869_v56 }
 0x2c6   :  { %v872_v60 = vpop.f32.mrf.mxu0 }
 0x2c7   :  { %v756_v61 = vadd.f32 %v871_v59, %v836_v57 }
 0x2c8   :  { %v873_v62 = vpop.f32.mrf.mxu0 }
 0x2c9   :  { %762 = vst [vmem:[%s1145_s7] sm:$0xff] %v756_v61  ;;  %v874_v63 = vadd.f32 %v873_v62, %v872_v60 }
 0x2cb   :  { %v759_v0 = vadd.f32 %v874_v63, %v836_v57 }
 0x2cd   :  { %763 = vst [vmem:[%s1145_s7 + $0x8] sm:$0xff] %v759_v0 }
 0x2ce   :  { %768 = vsyncpa [#allocation3], 1 }
 0x2cf   :  { %769 = vsyncpa [#allocation5], 1 }

</bundles_post_ra>
